<compile_context>
chip_gen: v5e
topology: v5e:2x2
jax: 0.10.0
libtpu: 0.0.40
codegen_flags: <defaults>
</compile_context>

<pallas_src>
import jax
import jax.numpy as jnp
from jax.experimental import pallas as pl
from jax.experimental.pallas import tpu as pltpu

C_HID = 64
BN_EPS = 1e-5
HALO = 8            # per-side halo rows (multiple of 8 -> aligned interior stores)
ROW_BUDGET = 2048   # target rows (batch_tile * L) per grid step


def _pick_batch_tile(n, l):
    """Batch tile so batch_tile*L ~ ROW_BUDGET rows; multiple of 8 if < N."""
    if n * l <= ROW_BUDGET:
        return n
    return max(8, (ROW_BUDGET // max(l, 1)) // 8 * 8)


# ---------------------------------------------------------------------------
# Kernel factory (tn, l are static Python ints baked into the traced body)
# ---------------------------------------------------------------------------
def _make_kernel(tn, l):
    def stage(pad_ref, h):
        """Write h (tn, l, C) into the interior of the halo-padded scratch."""
        c = pad_ref.shape[-1]
        zeros = jnp.zeros((tn, HALO, c), pad_ref.dtype)
        pad_ref[:, pl.ds(0, HALO), :] = zeros
        pad_ref[:, pl.ds(HALO + l, HALO), :] = zeros
        pad_ref[:, pl.ds(HALO, l), :] = h.astype(pad_ref.dtype)

    def conv_bn_relu(pad_ref, dilation, w_ref, scale_ref, shift_ref):
        """Dilated k=3 'same' conv + folded (bias+BN) + ReLU.

        pad_ref:  (tn, l + 2*HALO, Cin) halo-padded activations.
        w_ref:    (3*Cin, C_HID) tap-fused weights (same dtype as pad_ref).
        Returns   (tn*l, C_HID) float32.
        """
        cin = pad_ref.shape[-1]
        # tap k reads rows shifted by (k-1)*dilation; halos supply the zero pad
        taps = [pad_ref[:, pl.ds(HALO + (k - 1) * dilation, l), :] for k in range(3)]
        xi = jnp.concatenate(taps, axis=-1).reshape(tn * l, 3 * cin)
        acc = jnp.dot(xi, w_ref[...], preferred_element_type=jnp.float32)
        return jnp.maximum(acc * scale_ref[...] + shift_ref[...], 0.0)

    def kernel(x_ref,
               w1_ref, s1_ref, t1_ref,
               w2_ref, s2_ref, t2_ref,
               w3_ref, s3_ref, t3_ref,
               wfc_ref, bfc_ref,
               out_ref,
               pad1, pad2, pad3):
        stage(pad1, x_ref[...])                                   # f32 (Cin tiny)
        h = conv_bn_relu(pad1, 1, w1_ref, s1_ref, t1_ref)         # (tn*l, 64) f32
        # dropout1: identity at inference
        stage(pad2, h.reshape(tn, l, C_HID))                      # -> bf16 scratch
        h = conv_bn_relu(pad2, 2, w2_ref, s2_ref, t2_ref)
        # dropout2: identity at inference
        stage(pad3, h.reshape(tn, l, C_HID))
        h = conv_bn_relu(pad3, 4, w3_ref, s3_ref, t3_ref)
        # dropout3: identity at inference
        gap = jnp.mean(h.reshape(tn, l, C_HID), axis=1)           # (tn, 64) f32
        out_ref[...] = (jnp.dot(gap, wfc_ref[...],
                                preferred_element_type=jnp.float32)
                        + bfc_ref[...])                           # (tn, num_classes)

    return kernel


# ---------------------------------------------------------------------------
# Wrapper: batch-tiled grid, weights resident via constant index_maps
# ---------------------------------------------------------------------------
def dilated_conv1d_forward(x_ncl, p):
    """x_ncl: (N, C_in, L) float32 (PyTorch layout). Returns (N, num_classes)."""
    n, c_in, l = x_ncl.shape
    num_classes = p["wfc"].shape[1]
    x = jnp.transpose(x_ncl, (0, 2, 1)).astype(jnp.float32)       # (N, L, Cin)

    tn = _pick_batch_tile(n, l)
    n_tiles = -(-n // tn)
    n_pad = n_tiles * tn
    if n_pad != n:
        x = jnp.pad(x, ((0, n_pad - n), (0, 0), (0, 0)))

    # TODO(synk): add an L grid axis (receptive-field halo of 7 rows/side +
    # pl.when-gated GAP accumulator) for sequences too long for one VMEM tile.

    const2d = lambda arr: pl.BlockSpec(arr.shape, lambda i: (0, 0))
    kernel = _make_kernel(tn, l)

    out = pl.pallas_call(
        kernel,
        out_shape=jax.ShapeDtypeStruct((n_pad, num_classes), jnp.float32),
        grid=(n_tiles,),
        in_specs=[
            pl.BlockSpec((tn, l, c_in), lambda i: (i, 0, 0)),
            const2d(p["w1"]), const2d(p["s1"]), const2d(p["t1"]),
            const2d(p["w2"]), const2d(p["s2"]), const2d(p["t2"]),
            const2d(p["w3"]), const2d(p["s3"]), const2d(p["t3"]),
            const2d(p["wfc"]), const2d(p["bfc"]),
        ],
        out_specs=pl.BlockSpec((tn, num_classes), lambda i: (i, 0)),
        scratch_shapes=[
            pltpu.VMEM((tn, l + 2 * HALO, c_in), jnp.float32),    # layer-1 input
            pltpu.VMEM((tn, l + 2 * HALO, C_HID), jnp.bfloat16),  # layer-2 input
            pltpu.VMEM((tn, l + 2 * HALO, C_HID), jnp.bfloat16),  # layer-3 input
        ],
        compiler_params=pltpu.CompilerParams(
            dimension_semantics=("parallel",),
            vmem_limit_bytes=32 * 1024 * 1024),
    )(x, p["w1"], p["s1"], p["t1"], p["w2"], p["s2"], p["t2"],
      p["w3"], p["s3"], p["t3"], p["wfc"], p["bfc"])
    return out[:n]


# ---------------------------------------------------------------------------
# Deterministic parameter init (PyTorch-layout raw params + kernel-layout fold)
# ---------------------------------------------------------------------------
def init_raw_params(key, c_in, num_classes):
    ks = iter(jax.random.split(key, 32))
    raw = {}
    cin = c_in
    for i in (1, 2, 3):
        raw[f"conv{i}_w"] = jax.random.normal(next(ks), (C_HID, cin, 3), jnp.float32) * 0.1
        raw[f"conv{i}_b"] = jax.random.normal(next(ks), (C_HID,), jnp.float32) * 0.1
        raw[f"bn{i}_g"] = jax.random.uniform(next(ks), (C_HID,), jnp.float32, 0.5, 1.5)
        raw[f"bn{i}_b"] = jax.random.normal(next(ks), (C_HID,), jnp.float32) * 0.1
        raw[f"bn{i}_m"] = jax.random.normal(next(ks), (C_HID,), jnp.float32) * 0.1
        raw[f"bn{i}_v"] = jax.random.uniform(next(ks), (C_HID,), jnp.float32, 0.5, 1.5)
        cin = C_HID
    raw["fc_w"] = jax.random.normal(next(ks), (num_classes, C_HID), jnp.float32) * 0.1
    raw["fc_b"] = jax.random.normal(next(ks), (num_classes,), jnp.float32) * 0.1
    return raw


def fold_params(raw):
    p = {}
    # layer 1 kept in f32 (K = 3*Cin is tiny); hidden layers bf16 for the MXU.
    for i, w_dtype in zip((1, 2, 3), (jnp.float32, jnp.bfloat16, jnp.bfloat16)):
        w = jnp.transpose(raw[f"conv{i}_w"], (2, 1, 0))            # (K, Cin, Cout)
        k, cin, cout = w.shape
        p[f"w{i}"] = w.reshape(k * cin, cout).astype(w_dtype)      # tap-fused (3*Cin, 64)
        scale = raw[f"bn{i}_g"] / jnp.sqrt(raw[f"bn{i}_v"] + BN_EPS)
        shift = raw[f"bn{i}_b"] + (raw[f"conv{i}_b"] - raw[f"bn{i}_m"]) * scale
        p[f"s{i}"] = scale[None, :].astype(jnp.float32)
        p[f"t{i}"] = shift[None, :].astype(jnp.float32)
    p["wfc"] = raw["fc_w"].T.astype(jnp.float32)                   # (64, num_classes)
    p["bfc"] = raw["fc_b"][None, :].astype(jnp.float32)            # (1, num_classes)
    return p


# ---------------------------------------------------------------------------
# Pure-JAX reference (PyTorch semantics, NCL layout) for a sanity check
# ---------------------------------------------------------------------------
def reference_forward(x_ncl, raw):
    h = x_ncl
    for i, d in zip((1, 2, 3), (1, 2, 4)):
        h = jax.lax.conv_general_dilated(
            h, raw[f"conv{i}_w"], window_strides=(1,), padding=[(d, d)],
            rhs_dilation=(d,), dimension_numbers=("NCH", "OIH", "NCH"))
        h = h + raw[f"conv{i}_b"][None, :, None]
        scale = raw[f"bn{i}_g"] / jnp.sqrt(raw[f"bn{i}_v"] + BN_EPS)
        shift = raw[f"bn{i}_b"] - raw[f"bn{i}_m"] * scale
        h = jnp.maximum(h * scale[None, :, None] + shift[None, :, None], 0.0)
    gap = jnp.mean(h, axis=2)
    return gap @ raw["fc_w"].T + raw["fc_b"][None, :]


if __name__ == "__main__":
    N, C_IN, L, NUM_CLASSES = 2, 4, 16, 3

    key = jax.random.PRNGKey(0)
    k_x, k_p = jax.random.split(key)
    x = jax.random.normal(k_x, (N, C_IN, L), jnp.float32)   # PyTorch NCL input

    raw = init_raw_params(k_p, C_IN, NUM_CLASSES)
    params = fold_params(raw)

    out = jax.block_until_ready(dilated_conv1d_forward(x, params))
    ref = jax.block_until_ready(reference_forward(x, raw))

    assert out.shape == (N, NUM_CLASSES)
    # bf16 matmul operands (f32 accumulation) -> slightly looser tolerance.
    assert jnp.allclose(out, ref, atol=2e-2, rtol=2e-2), (out, ref)

    print("KERNEL_OK")
</pallas_src>

<mosaic_0001>
module attributes {stable_mosaic.version = 11 : i64} {
  func.func @kernel(%arg0: i32, %arg1: memref<2x16x4xf32, #tpu.memory_space<vmem>>, %arg2: memref<12x64xf32, #tpu.memory_space<vmem>>, %arg3: memref<1x64xf32, #tpu.memory_space<vmem>>, %arg4: memref<1x64xf32, #tpu.memory_space<vmem>>, %arg5: memref<192x64xbf16, #tpu.memory_space<vmem>>, %arg6: memref<1x64xf32, #tpu.memory_space<vmem>>, %arg7: memref<1x64xf32, #tpu.memory_space<vmem>>, %arg8: memref<192x64xbf16, #tpu.memory_space<vmem>>, %arg9: memref<1x64xf32, #tpu.memory_space<vmem>>, %arg10: memref<1x64xf32, #tpu.memory_space<vmem>>, %arg11: memref<64x3xf32, #tpu.memory_space<vmem>>, %arg12: memref<1x3xf32, #tpu.memory_space<vmem>>, %arg13: memref<2x3xf32, #tpu.memory_space<vmem>>, %arg14: memref<2x32x4xf32, #tpu.memory_space<vmem>>, %arg15: memref<2x32x64xbf16, #tpu.memory_space<vmem>>, %arg16: memref<2x32x64xbf16, #tpu.memory_space<vmem>>) attributes {dimension_semantics = [#tpu.dimension_semantics<parallel>], iteration_bounds = array<i64: 1>, scalar_prefetch = 0 : i64, scratch_operands = 3 : i64, tpu.core_type = #tpu.core_type<tc>, window_params = [{transform_indices = @transform_0, window_bounds = array<i64: 2, 16, 4>}, {pipeline_mode = #tpu.pipeline_mode<synchronous>, transform_indices = @transform_1, window_bounds = array<i64: 12, 64>}, {pipeline_mode = #tpu.pipeline_mode<synchronous>, transform_indices = @transform_2, window_bounds = array<i64: 1, 64>}, {pipeline_mode = #tpu.pipeline_mode<synchronous>, transform_indices = @transform_3, window_bounds = array<i64: 1, 64>}, {pipeline_mode = #tpu.pipeline_mode<synchronous>, transform_indices = @transform_4, window_bounds = array<i64: 192, 64>}, {pipeline_mode = #tpu.pipeline_mode<synchronous>, transform_indices = @transform_5, window_bounds = array<i64: 1, 64>}, {pipeline_mode = #tpu.pipeline_mode<synchronous>, transform_indices = @transform_6, window_bounds = array<i64: 1, 64>}, {pipeline_mode = #tpu.pipeline_mode<synchronous>, transform_indices = @transform_7, window_bounds = array<i64: 192, 64>}, {pipeline_mode = #tpu.pipeline_mode<synchronous>, transform_indices = @transform_8, window_bounds = array<i64: 1, 64>}, {pipeline_mode = #tpu.pipeline_mode<synchronous>, transform_indices = @transform_9, window_bounds = array<i64: 1, 64>}, {pipeline_mode = #tpu.pipeline_mode<synchronous>, transform_indices = @transform_10, window_bounds = array<i64: 64, 3>}, {pipeline_mode = #tpu.pipeline_mode<synchronous>, transform_indices = @transform_11, window_bounds = array<i64: 1, 3>}, {transform_indices = @transform_12, window_bounds = array<i64: 2, 3>}]} {
    %c0 = arith.constant 0 : index
    %c0_0 = arith.constant 0 : index
    %c0_1 = arith.constant 0 : index
    %0 = vector.load %arg1[%c0, %c0_0, %c0_1] : memref<2x16x4xf32, #tpu.memory_space<vmem>>, vector<2x16x4xf32>
    %cst = arith.constant 0.000000e+00 : f32
    %1 = vector.broadcast %cst : f32 to vector<2x8x4xf32>
    %c0_2 = arith.constant 0 : index
    %c0_3 = arith.constant 0 : index
    %c0_4 = arith.constant 0 : index
    %2 = vector.load %arg14[%c0_2, %c0_3, %c0_4] : memref<2x32x4xf32, #tpu.memory_space<vmem>>, vector<2x8x4xf32>
    tpu.vector_store %arg14[%c0_2, %c0_3, %c0_4], %1 {strides = array<i32>} : memref<2x32x4xf32, #tpu.memory_space<vmem>>, vector<2x8x4xf32>,
    %c0_5 = arith.constant 0 : index
    %c24 = arith.constant 24 : index
    %c0_6 = arith.constant 0 : index
    %3 = vector.load %arg14[%c0_5, %c24, %c0_6] : memref<2x32x4xf32, #tpu.memory_space<vmem>>, vector<2x8x4xf32>
    tpu.vector_store %arg14[%c0_5, %c24, %c0_6], %1 {strides = array<i32>} : memref<2x32x4xf32, #tpu.memory_space<vmem>>, vector<2x8x4xf32>,
    %c0_7 = arith.constant 0 : index
    %c8 = arith.constant 8 : index
    %c0_8 = arith.constant 0 : index
    %4 = vector.load %arg14[%c0_7, %c8, %c0_8] : memref<2x32x4xf32, #tpu.memory_space<vmem>>, vector<2x16x4xf32>
    tpu.vector_store %arg14[%c0_7, %c8, %c0_8], %0 {strides = array<i32>} : memref<2x32x4xf32, #tpu.memory_space<vmem>>, vector<2x16x4xf32>,
    %c0_9 = arith.constant 0 : index
    %c7 = arith.constant 7 : index
    %c0_10 = arith.constant 0 : index
    %5 = vector.load %arg14[%c0_9, %c7, %c0_10] : memref<2x32x4xf32, #tpu.memory_space<vmem>>, vector<2x16x4xf32>
    %c0_11 = arith.constant 0 : index
    %c8_12 = arith.constant 8 : index
    %c0_13 = arith.constant 0 : index
    %6 = vector.load %arg14[%c0_11, %c8_12, %c0_13] : memref<2x32x4xf32, #tpu.memory_space<vmem>>, vector<2x16x4xf32>
    %c0_14 = arith.constant 0 : index
    %c9 = arith.constant 9 : index
    %c0_15 = arith.constant 0 : index
    %7 = vector.load %arg14[%c0_14, %c9, %c0_15] : memref<2x32x4xf32, #tpu.memory_space<vmem>>, vector<2x16x4xf32>
    %8 = tpu.concatenate %5, %6, %7 in 2 : vector<2x16x4xf32>, vector<2x16x4xf32>, vector<2x16x4xf32> -> vector<2x16x12xf32>
    %9 = vector.shape_cast %8 : vector<2x16x12xf32> to vector<32x12xf32>
    %c0_16 = arith.constant 0 : index
    %c0_17 = arith.constant 0 : index
    %10 = vector.load %arg2[%c0_16, %c0_17] : memref<12x64xf32, #tpu.memory_space<vmem>>, vector<12x64xf32>
    %cst_18 = arith.constant dense<0.000000e+00> : vector<32x64xf32>
    %11 = tpu.matmul %9, %10, %cst_18 {dimension_numbers = #tpu.dot_dimension_numbers<[1], [0], [0], [1], [0, 0, 1, 1], [], []>} : vector<32x12xf32>, vector<12x64xf32>, vector<32x64xf32> -> vector<32x64xf32>
    %c0_19 = arith.constant 0 : index
    %c0_20 = arith.constant 0 : index
    %12 = vector.load %arg3[%c0_19, %c0_20] : memref<1x64xf32, #tpu.memory_space<vmem>>, vector<1x64xf32>
    %13 = vector.broadcast %12 : vector<1x64xf32> to vector<32x64xf32>
    %14 = arith.mulf %11, %13 : vector<32x64xf32>
    %c0_21 = arith.constant 0 : index
    %c0_22 = arith.constant 0 : index
    %15 = vector.load %arg4[%c0_21, %c0_22] : memref<1x64xf32, #tpu.memory_space<vmem>>, vector<1x64xf32>
    %16 = vector.broadcast %15 : vector<1x64xf32> to vector<32x64xf32>
    %17 = arith.addf %14, %16 : vector<32x64xf32>
    %cst_23 = arith.constant 0.000000e+00 : f32
    %18 = vector.broadcast %cst_23 : f32 to vector<32x64xf32>
    %19 = arith.maximumf %17, %18 : vector<32x64xf32>
    %20 = vector.shape_cast %19 : vector<32x64xf32> to vector<2x16x64xf32>
    %cst_24 = arith.constant 0.000000e+00 : bf16
    %21 = vector.broadcast %cst_24 : bf16 to vector<2x8x64xbf16>
    %c0_25 = arith.constant 0 : index
    %c0_26 = arith.constant 0 : index
    %c0_27 = arith.constant 0 : index
    %22 = vector.load %arg15[%c0_25, %c0_26, %c0_27] : memref<2x32x64xbf16, #tpu.memory_space<vmem>>, vector<2x8x64xbf16>
    tpu.vector_store %arg15[%c0_25, %c0_26, %c0_27], %21 {strides = array<i32>} : memref<2x32x64xbf16, #tpu.memory_space<vmem>>, vector<2x8x64xbf16>,
    %c0_28 = arith.constant 0 : index
    %c24_29 = arith.constant 24 : index
    %c0_30 = arith.constant 0 : index
    %23 = vector.load %arg15[%c0_28, %c24_29, %c0_30] : memref<2x32x64xbf16, #tpu.memory_space<vmem>>, vector<2x8x64xbf16>
    tpu.vector_store %arg15[%c0_28, %c24_29, %c0_30], %21 {strides = array<i32>} : memref<2x32x64xbf16, #tpu.memory_space<vmem>>, vector<2x8x64xbf16>,
    %24 = arith.truncf %20 : vector<2x16x64xf32> to vector<2x16x64xbf16>
    %c0_31 = arith.constant 0 : index
    %c8_32 = arith.constant 8 : index
    %c0_33 = arith.constant 0 : index
    %25 = vector.load %arg15[%c0_31, %c8_32, %c0_33] : memref<2x32x64xbf16, #tpu.memory_space<vmem>>, vector<2x16x64xbf16>
    tpu.vector_store %arg15[%c0_31, %c8_32, %c0_33], %24 {strides = array<i32>} : memref<2x32x64xbf16, #tpu.memory_space<vmem>>, vector<2x16x64xbf16>,
    %c0_34 = arith.constant 0 : index
    %c6 = arith.constant 6 : index
    %c0_35 = arith.constant 0 : index
    %26 = vector.load %arg15[%c0_34, %c6, %c0_35] : memref<2x32x64xbf16, #tpu.memory_space<vmem>>, vector<2x16x64xbf16>
    %c0_36 = arith.constant 0 : index
    %c8_37 = arith.constant 8 : index
    %c0_38 = arith.constant 0 : index
    %27 = vector.load %arg15[%c0_36, %c8_37, %c0_38] : memref<2x32x64xbf16, #tpu.memory_space<vmem>>, vector<2x16x64xbf16>
    %c0_39 = arith.constant 0 : index
    %c10 = arith.constant 10 : index
    %c0_40 = arith.constant 0 : index
    %28 = vector.load %arg15[%c0_39, %c10, %c0_40] : memref<2x32x64xbf16, #tpu.memory_space<vmem>>, vector<2x16x64xbf16>
    %29 = tpu.concatenate %26, %27, %28 in 2 : vector<2x16x64xbf16>, vector<2x16x64xbf16>, vector<2x16x64xbf16> -> vector<2x16x192xbf16>
    %30 = vector.shape_cast %29 : vector<2x16x192xbf16> to vector<32x192xbf16>
    %c0_41 = arith.constant 0 : index
    %c0_42 = arith.constant 0 : index
    %31 = vector.load %arg5[%c0_41, %c0_42] : memref<192x64xbf16, #tpu.memory_space<vmem>>, vector<192x64xbf16>
    %cst_43 = arith.constant dense<0.000000e+00> : vector<32x64xf32>
    %32 = tpu.matmul %30, %31, %cst_43 {dimension_numbers = #tpu.dot_dimension_numbers<[1], [0], [0], [1], [0, 0, 1, 1], [], []>} : vector<32x192xbf16>, vector<192x64xbf16>, vector<32x64xf32> -> vector<32x64xf32>
    %c0_44 = arith.constant 0 : index
    %c0_45 = arith.constant 0 : index
    %33 = vector.load %arg6[%c0_44, %c0_45] : memref<1x64xf32, #tpu.memory_space<vmem>>, vector<1x64xf32>
    %34 = vector.broadcast %33 : vector<1x64xf32> to vector<32x64xf32>
    %35 = arith.mulf %32, %34 : vector<32x64xf32>
    %c0_46 = arith.constant 0 : index
    %c0_47 = arith.constant 0 : index
    %36 = vector.load %arg7[%c0_46, %c0_47] : memref<1x64xf32, #tpu.memory_space<vmem>>, vector<1x64xf32>
    %37 = vector.broadcast %36 : vector<1x64xf32> to vector<32x64xf32>
    %38 = arith.addf %35, %37 : vector<32x64xf32>
    %cst_48 = arith.constant 0.000000e+00 : f32
    %39 = vector.broadcast %cst_48 : f32 to vector<32x64xf32>
    %40 = arith.maximumf %38, %39 : vector<32x64xf32>
    %41 = vector.shape_cast %40 : vector<32x64xf32> to vector<2x16x64xf32>
    %cst_49 = arith.constant 0.000000e+00 : bf16
    %42 = vector.broadcast %cst_49 : bf16 to vector<2x8x64xbf16>
    %c0_50 = arith.constant 0 : index
    %c0_51 = arith.constant 0 : index
    %c0_52 = arith.constant 0 : index
    %43 = vector.load %arg16[%c0_50, %c0_51, %c0_52] : memref<2x32x64xbf16, #tpu.memory_space<vmem>>, vector<2x8x64xbf16>
    tpu.vector_store %arg16[%c0_50, %c0_51, %c0_52], %42 {strides = array<i32>} : memref<2x32x64xbf16, #tpu.memory_space<vmem>>, vector<2x8x64xbf16>,
    %c0_53 = arith.constant 0 : index
    %c24_54 = arith.constant 24 : index
    %c0_55 = arith.constant 0 : index
    %44 = vector.load %arg16[%c0_53, %c24_54, %c0_55] : memref<2x32x64xbf16, #tpu.memory_space<vmem>>, vector<2x8x64xbf16>
    tpu.vector_store %arg16[%c0_53, %c24_54, %c0_55], %42 {strides = array<i32>} : memref<2x32x64xbf16, #tpu.memory_space<vmem>>, vector<2x8x64xbf16>,
    %45 = arith.truncf %41 : vector<2x16x64xf32> to vector<2x16x64xbf16>
    %c0_56 = arith.constant 0 : index
    %c8_57 = arith.constant 8 : index
    %c0_58 = arith.constant 0 : index
    %46 = vector.load %arg16[%c0_56, %c8_57, %c0_58] : memref<2x32x64xbf16, #tpu.memory_space<vmem>>, vector<2x16x64xbf16>
    tpu.vector_store %arg16[%c0_56, %c8_57, %c0_58], %45 {strides = array<i32>} : memref<2x32x64xbf16, #tpu.memory_space<vmem>>, vector<2x16x64xbf16>,
    %c0_59 = arith.constant 0 : index
    %c4 = arith.constant 4 : index
    %c0_60 = arith.constant 0 : index
    %47 = vector.load %arg16[%c0_59, %c4, %c0_60] : memref<2x32x64xbf16, #tpu.memory_space<vmem>>, vector<2x16x64xbf16>
    %c0_61 = arith.constant 0 : index
    %c8_62 = arith.constant 8 : index
    %c0_63 = arith.constant 0 : index
    %48 = vector.load %arg16[%c0_61, %c8_62, %c0_63] : memref<2x32x64xbf16, #tpu.memory_space<vmem>>, vector<2x16x64xbf16>
    %c0_64 = arith.constant 0 : index
    %c12 = arith.constant 12 : index
    %c0_65 = arith.constant 0 : index
    %49 = vector.load %arg16[%c0_64, %c12, %c0_65] : memref<2x32x64xbf16, #tpu.memory_space<vmem>>, vector<2x16x64xbf16>
    %50 = tpu.concatenate %47, %48, %49 in 2 : vector<2x16x64xbf16>, vector<2x16x64xbf16>, vector<2x16x64xbf16> -> vector<2x16x192xbf16>
    %51 = vector.shape_cast %50 : vector<2x16x192xbf16> to vector<32x192xbf16>
    %c0_66 = arith.constant 0 : index
    %c0_67 = arith.constant 0 : index
    %52 = vector.load %arg8[%c0_66, %c0_67] : memref<192x64xbf16, #tpu.memory_space<vmem>>, vector<192x64xbf16>
    %cst_68 = arith.constant dense<0.000000e+00> : vector<32x64xf32>
    %53 = tpu.matmul %51, %52, %cst_68 {dimension_numbers = #tpu.dot_dimension_numbers<[1], [0], [0], [1], [0, 0, 1, 1], [], []>} : vector<32x192xbf16>, vector<192x64xbf16>, vector<32x64xf32> -> vector<32x64xf32>
    %c0_69 = arith.constant 0 : index
    %c0_70 = arith.constant 0 : index
    %54 = vector.load %arg9[%c0_69, %c0_70] : memref<1x64xf32, #tpu.memory_space<vmem>>, vector<1x64xf32>
    %55 = vector.broadcast %54 : vector<1x64xf32> to vector<32x64xf32>
    %56 = arith.mulf %53, %55 : vector<32x64xf32>
    %c0_71 = arith.constant 0 : index
    %c0_72 = arith.constant 0 : index
    %57 = vector.load %arg10[%c0_71, %c0_72] : memref<1x64xf32, #tpu.memory_space<vmem>>, vector<1x64xf32>
    %58 = vector.broadcast %57 : vector<1x64xf32> to vector<32x64xf32>
    %59 = arith.addf %56, %58 : vector<32x64xf32>
    %cst_73 = arith.constant 0.000000e+00 : f32
    %60 = vector.broadcast %cst_73 : f32 to vector<32x64xf32>
    %61 = arith.maximumf %59, %60 : vector<32x64xf32>
    %62 = vector.shape_cast %61 : vector<32x64xf32> to vector<2x16x64xf32>
    %cst_74 = arith.constant dense<0.000000e+00> : vector<2x64xf32>
    %63 = vector.multi_reduction <add>, %62, %cst_74 [1] : vector<2x16x64xf32> to vector<2x64xf32>
    %cst_75 = arith.constant 1.600000e+01 : f32
    %64 = vector.broadcast %cst_75 : f32 to vector<2x64xf32>
    %65 = arith.divf %63, %64 : vector<2x64xf32>
    %c0_76 = arith.constant 0 : index
    %c0_77 = arith.constant 0 : index
    %66 = vector.load %arg11[%c0_76, %c0_77] : memref<64x3xf32, #tpu.memory_space<vmem>>, vector<64x3xf32>
    %cst_78 = arith.constant dense<0.000000e+00> : vector<2x3xf32>
    %67 = tpu.matmul %65, %66, %cst_78 {dimension_numbers = #tpu.dot_dimension_numbers<[1], [0], [0], [1], [0, 0, 1, 1], [], []>} : vector<2x64xf32>, vector<64x3xf32>, vector<2x3xf32> -> vector<2x3xf32>
    %c0_79 = arith.constant 0 : index
    %c0_80 = arith.constant 0 : index
    %68 = vector.load %arg12[%c0_79, %c0_80] : memref<1x3xf32, #tpu.memory_space<vmem>>, vector<1x3xf32>
    %69 = vector.broadcast %68 : vector<1x3xf32> to vector<2x3xf32>
    %70 = arith.addf %67, %69 : vector<2x3xf32>
    %c0_81 = arith.constant 0 : index
    %c0_82 = arith.constant 0 : index
    %71 = vector.load %arg13[%c0_81, %c0_82] : memref<2x3xf32, #tpu.memory_space<vmem>>, vector<2x3xf32>
    tpu.vector_store %arg13[%c0_81, %c0_82], %70 {strides = array<i32>} : memref<2x3xf32, #tpu.memory_space<vmem>>, vector<2x3xf32>,
    return
  }
  func.func @transform_0(%arg0: i32) -> (i32, i32, i32) {
    %c0_i32 = arith.constant 0 : i32
    %c0_i32_0 = arith.constant 0 : i32
    %c0_i32_1 = arith.constant 0 : i32
    return %arg0, %c0_i32, %c0_i32_0 : i32, i32, i32
  }
  func.func @transform_1(%arg0: i32) -> (i32, i32) {
    %c0_i32 = arith.constant 0 : i32
    %c0_i32_0 = arith.constant 0 : i32
    %c0_i32_1 = arith.constant 0 : i32
    return %c0_i32, %c0_i32_0 : i32, i32
  }
  func.func @transform_2(%arg0: i32) -> (i32, i32) {
    %c0_i32 = arith.constant 0 : i32
    %c0_i32_0 = arith.constant 0 : i32
    %c0_i32_1 = arith.constant 0 : i32
    return %c0_i32, %c0_i32_0 : i32, i32
  }
  func.func @transform_3(%arg0: i32) -> (i32, i32) {
    %c0_i32 = arith.constant 0 : i32
    %c0_i32_0 = arith.constant 0 : i32
    %c0_i32_1 = arith.constant 0 : i32
    return %c0_i32, %c0_i32_0 : i32, i32
  }
  func.func @transform_4(%arg0: i32) -> (i32, i32) {
    %c0_i32 = arith.constant 0 : i32
    %c0_i32_0 = arith.constant 0 : i32
    %c0_i32_1 = arith.constant 0 : i32
    return %c0_i32, %c0_i32_0 : i32, i32
  }
  func.func @transform_5(%arg0: i32) -> (i32, i32) {
    %c0_i32 = arith.constant 0 : i32
    %c0_i32_0 = arith.constant 0 : i32
    %c0_i32_1 = arith.constant 0 : i32
    return %c0_i32, %c0_i32_0 : i32, i32
  }
  func.func @transform_6(%arg0: i32) -> (i32, i32) {
    %c0_i32 = arith.constant 0 : i32
    %c0_i32_0 = arith.constant 0 : i32
    %c0_i32_1 = arith.constant 0 : i32
    return %c0_i32, %c0_i32_0 : i32, i32
  }
  func.func @transform_7(%arg0: i32) -> (i32, i32) {
    %c0_i32 = arith.constant 0 : i32
    %c0_i32_0 = arith.constant 0 : i32
    %c0_i32_1 = arith.constant 0 : i32
    return %c0_i32, %c0_i32_0 : i32, i32
  }
  func.func @transform_8(%arg0: i32) -> (i32, i32) {
    %c0_i32 = arith.constant 0 : i32
    %c0_i32_0 = arith.constant 0 : i32
    %c0_i32_1 = arith.constant 0 : i32
    return %c0_i32, %c0_i32_0 : i32, i32
  }
  func.func @transform_9(%arg0: i32) -> (i32, i32) {
    %c0_i32 = arith.constant 0 : i32
    %c0_i32_0 = arith.constant 0 : i32
    %c0_i32_1 = arith.constant 0 : i32
    return %c0_i32, %c0_i32_0 : i32, i32
  }
  func.func @transform_10(%arg0: i32) -> (i32, i32) {
    %c0_i32 = arith.constant 0 : i32
    %c0_i32_0 = arith.constant 0 : i32
    %c0_i32_1 = arith.constant 0 : i32
    return %c0_i32, %c0_i32_0 : i32, i32
  }
  func.func @transform_11(%arg0: i32) -> (i32, i32) {
    %c0_i32 = arith.constant 0 : i32
    %c0_i32_0 = arith.constant 0 : i32
    %c0_i32_1 = arith.constant 0 : i32
    return %c0_i32, %c0_i32_0 : i32, i32
  }
  func.func @transform_12(%arg0: i32) -> (i32, i32) {
    %c0_i32 = arith.constant 0 : i32
    %c0_i32_0 = arith.constant 0 : i32
    return %arg0, %c0_i32 : i32, i32
  }
}

</mosaic_0001>

<bundles_post_ra>
// kernel: tpu_custom_call.1
= control target key start
LH: loop header
LB: loop body
LE: loop exit
PB: predicated region body
PF: predicated region fallthrough
CT: control target
= control target key end

     0   :  { %vm47_vm0 = vcmask 31744   ;;  %v981_v2 = vmov 0.0   ;;  %s1261_s0 = inlined_call_operand.vmem [shape: f32[2,16,4], index: 0, kind: input, shape index: {}]   ;;  %s1262_s1 = inlined_call_operand.vmem [shape: f32[12,64], index: 1, kind: input, shape index: {}]   ;;  %s1263_s2 = inlined_call_operand.vmem [shape: f32[1,64], index: 2, kind: input, shape index: {}]   ;;  %s1264_s3 = inlined_call_operand.vmem [shape: f32[1,64], index: 3, kind: input, shape index: {}]   ;;  %s1265_s4 = inlined_call_operand.vmem [shape: bf16[192,64], index: 4, kind: input, shape index: {}]   ;;  %s1266_s5 = inlined_call_operand.vmem [shape: f32[1,64], index: 5, kind: input, shape index: {}]   ;;  %s1267_s6 = inlined_call_operand.vmem [shape: f32[1,64], index: 6, kind: input, shape index: {}]   ;;  %s1268_s7 = inlined_call_operand.vmem [shape: bf16[192,64], index: 7, kind: input, shape index: {}]   ;;  %s1269_s8 = inlined_call_operand.vmem [shape: f32[1,64], index: 8, kind: input, shape index: {}]   ;;  %s1270_s9 = inlined_call_operand.vmem [shape: f32[1,64], index: 9, kind: input, shape index: {}]   ;;  %s1271_s10 = inlined_call_operand.vmem [shape: f32[64,3], index: 10, kind: input, shape index: {}]   ;;  %s1272_s11 = inlined_call_operand.vmem [shape: f32[1,3], index: 11, kind: input, shape index: {}]   ;;  %s1273_s12 = inlined_call_operand.hbm [shape: f32[2,3], index: 12, kind: output, shape index: {}]  }
   0x1   :  { %v43_v0 = vld [vmem:[%s1261_s0] sm:$0xff]  ;;  %v44_v1 = vld [vmem:[%s1261_s0 + $0x8] sm:$0xff]  ;;  %50 = vst.msk [vmem:[#allocation2 + $0x18] sm:$0xff] %vm47_vm0, %v981_v2  ;;  %v46_v3 = vld [vmem:[%s1261_s0 + $0x18] sm:$0xff] }
   0x2   :  { %52 = vst.msk [vmem:[#allocation2 + $0x8] sm:$0xff] %vm47_vm0, %v43_v0  ;;  %v45_v4 = vld [vmem:[%s1261_s0 + $0x10] sm:$0xff] }
   0x3   :  { %53 = vst.msk [vmem:[#allocation2 + $0x10] sm:$0xff] %vm47_vm0, %v44_v1 }
   0x4   :  { %48 = vst.msk [vmem:[#allocation2] sm:$0xff] %vm47_vm0, %v981_v2 }
   0x5   :  { %49 = vst.msk [vmem:[#allocation2 + $0x20] sm:$0xff] %vm47_vm0, %v981_v2 }
   0x6   :  { %17 = vsyncpa [#allocation6], 0  ;;  %51 = vst.msk [vmem:[#allocation2 + $0x38] sm:$0xff] %vm47_vm0, %v981_v2  ;;  %s982_s29 = smov 4   ;;  %s983_s30 = smov 8   ;;  %vm124_vm1 = vcmask 1043456  }
   0x7   :  { %55 = vst.msk [vmem:[#allocation2 + $0x30] sm:$0xff] %vm47_vm0, %v46_v3  ;;  %v110_v13 = vld [vmem:[%s1262_s1 + $0x8] sm:$0xf]  ;;  %v109_v14 = vld [vmem:[%s1262_s1] sm:$0xff]  ;;  %vm104_vm2 = vcmask 64512   ;;  %vm111_vm3 = vcmask 97280  }
   0x8   :  { %54 = vst.msk [vmem:[#allocation2 + $0x28] sm:$0xff] %vm47_vm0, %v45_v4  ;;  %775 = vmatpush.msk.msra.mxu0 %vm124_vm1, %v110_v13  ;;  %905 = vmatpush.msk.msra.mxu2 %vm124_vm1, %v110_v13  ;;  %vm177_vm4 = vcmask 519168   ;;  %v984_v35 = vmov 0   ;;  %v892_v36 = vld [vmem:[%s1265_s4 + $0x58] sm:$0xff]  ;;  %v914_v37 = vld [vmem:[%s1263_s2] ss:$0 sm:$0xff] }
   0x9   :  { %v60_v5 = vld [vmem:[#allocation2 + $0x8] sm:$0xff]  ;;  %180 = vst.msk [vmem:[#allocation3 + $0xc] sm:$0xf] %vm177_vm4, %v984_v35  ;;  %v915_v39 = vld [vmem:[%s1264_s3] ss:$0 sm:$0xff]  ;;  %v891_v41 = vld [vmem:[%s1265_s4 + $0x50] sm:$0xff] }
   0xa   :  { %72 = vrot.lane.b32.xlu0 %v60_v5, %s982_s29  ;;  %v61_v6 = vld [vmem:[#allocation2 + $0x10] sm:$0xff]  ;;  %143 = vmatpush.msra.mxu0 %v109_v14  ;;  %178 = vst.msk [vmem:[#allocation3] sm:$0xf] %vm177_vm4, %v984_v35  ;;  %v890_v43 = vld [vmem:[%s1265_s4 + $0x48] sm:$0xff]  ;;  %v889_v46 = vld [vmem:[%s1265_s4 + $0x40] sm:$0xff]  ;;  %vm242_vm5 = vcmask 1041408  }
   0xb   :  { %74 = vrot.lane.b32.xlu1 %v61_v6, %s982_s29  ;;  %v64_v7 = vld [vmem:[#allocation2 + $0x9] sm:$0xff]  ;;  %v65_v8 = vld [vmem:[#allocation2 + $0x11] sm:$0xff]  ;;  %906 = vmatpush.msra.mxu2 %v109_v14  ;;  %179 = vst.msk [vmem:[#allocation3 + $0x10] sm:$0xf] %vm177_vm4, %v984_v35  ;;  %v885_v13 = vld [vmem:[%s1265_s4 + $0x20] sm:$0xff]  ;;  %s985_s14 = smov 64  }
   0xc   :  { %v56_v22 = vld [vmem:[#allocation2 + $0x7] sm:$0xff]  ;;  %v57_v27 = vld [vmem:[#allocation2 + $0xf] sm:$0xff]  ;;  %181 = vst.msk [vmem:[#allocation3 + $0x1c] sm:$0xf] %vm177_vm4, %v984_v35  ;;  %v888_v62 = vld [vmem:[%s1265_s4 + $0x38] sm:$0xff]  ;;  %vm264_vm6 = vcmask 1044480  }
   0xd   :  { %404 = vmatpush.bf16.msrb.mxu2 %v892_v36  ;;  %439 = vst.msk [vmem:[#allocation4] sm:$0xf] %vm177_vm4, %v984_v35  ;;  %381 = vmatpush.bf16.msra.mxu1 %v888_v62  ;;  %v887_v0 = vld [vmem:[%s1265_s4 + $0x30] sm:$0xff]  ;;  %vm249_vm7 = vcmask 523264   ;;  %vm517_vm8 = vcmask 1045504   ;;  %vm733_vm10 = vcmask 1041409  }
   0xe   :  { %v63_v11 = vld [vmem:[#allocation2 + $0x30] sm:$0xff]  ;;  %440 = vst.msk [vmem:[#allocation4 + $0x10] sm:$0xf] %vm177_vm4, %v984_v35  ;;  %s987_s19 = smov [#allocation5]   ;;  %s766_s22 = sshll.u32 %s1273_s12, 4  ;;  %vm757_vm11 = vcmask 17408   ;;  %s767_s22 = int_to_ptr.hbm [resolvable:$true] %s766_s22 }
   0xf   :  { %v62_v9 = vld [vmem:[#allocation2 + $0x28] sm:$0xff]  ;;  %v67_v12 = vld [vmem:[#allocation2 + $0x31] sm:$0xff]  ;;  %441 = vst.msk [vmem:[#allocation4 + $0xc] sm:$0xf] %vm177_vm4, %v984_v35  ;;  %s764_s20 = sshll.u32 %s987_s19, 4  ;;  %s765_s20 = int_to_ptr.vmem [resolvable:$true] %s764_s20 }
  0x10   :  { %76 = vrot.lane.b32.xlu2 %v62_v9, %s982_s29  ;;  %v66_v10 = vld [vmem:[#allocation2 + $0x29] sm:$0xff]  ;;  %442 = vst.msk [vmem:[#allocation4 + $0x1c] sm:$0xf] %vm177_vm4, %v984_v35  ;;  %v881_v35 = vld [vmem:[%s1265_s4] sm:$0xff] }
  0x11   :  { %v58_v16 = vld [vmem:[#allocation2 + $0x27] sm:$0xff]  ;;  %v59_v29 = vld [vmem:[#allocation2 + $0x2f] sm:$0xff]  ;;  %405 = vmatpush.bf16.msrb.mxu2 %v891_v41  ;;  %382 = vmatpush.bf16.msra.mxu1 %v887_v0  ;;  %v931_v36 = vld [vmem:[#allocation3] sm:$0x8] }
  0x12   :  { %88 = vrot.lane.b32.xlu0 %v64_v7, %s983_s30  ;;  %v199_v59 = vld [vmem:[#allocation3 + $0xc] sm:$0x1] }
  0x13   :  { %90 = vrot.lane.b32.xlu1 %v65_v8, %s983_s30  ;;  %v235_v61 = vunpack.c.l.b16 %v199_v59  ;;  %v886_v7 = vld [vmem:[%s1265_s4 + $0x28] sm:$0xff]  ;;  %v903_v59 = vld [vmem:[%s1268_s7 + $0x50] sm:$0xff] }
  0x15   :  { %406 = vmatpush.bf16.msrb.mxu2 %v890_v43  ;;  %v239_v3 = vpack.c.b16 %v235_v61, %v235_v61  ;;  %383 = vmatpush.bf16.msra.mxu1 %v886_v7  ;;  %v901_v61 = vld [vmem:[%s1268_s7 + $0x40] sm:$0xff] }
  0x17   :  { %v244_v9 = vrot.slane %v239_v3, 6 }
  0x18   :  { %92 = vrot.lane.b32.xlu2 %v66_v10, %s983_s30  ;;  %v201_v10 = vld [vmem:[#allocation3 + $0x1c] sm:$0x1] }
  0x19   :  { %407 = vmatpush.bf16.msrb.mxu2 %v889_v46  ;;  %384 = vmatpush.bf16.msra.mxu1 %v885_v13 }
  0x1a   :  { %78 = vrot.lane.b32.xlu0 %v63_v11, %s982_s29 }
  0x1b   :  { %94 = vrot.lane.b32.xlu1 %v67_v12, %s983_s30 }
  0x6a   :  { %v77_v15 = vpop.permute.xlu2 %76 }
  0x6b   :  { %v102_v17 = vsel %vm47_vm0, %v58_v16, %v77_v15 }
  0x72   :  { %v93_v18 = vpop.permute.xlu2 %92 }
  0x73   :  { %v107_v19 = vsel %vm104_vm2, %v102_v17, %v93_v18 }
  0x74   :  { %778 = vmatmul.msk.f32.vlgmr.msra.gmra.mxu2 %vm111_vm3, %v107_v19 }
  0x7c   :  { %v73_v20 = vpop.permute.xlu0 %72 }
  0x7d   :  { %v75_v21 = vpop.permute.xlu1 %74  ;;  %v100_v23 = vsel %vm47_vm0, %v56_v22, %v73_v20  ;;  %v237_v20 = vunpack.c.l.b16 %v201_v10  ;;  %v884_v22 = vld [vmem:[%s1265_s4 + $0x18] sm:$0xff] }
  0x7e   :  { %v101_v28 = vsel %vm47_vm0, %v57_v27, %v75_v21  ;;  %385 = vmatpush.bf16.msra.mxu1 %v884_v22  ;;  %v883_v27 = vld [vmem:[%s1265_s4 + $0x10] sm:$0xff] }
  0x82   :  { %386 = vmatpush.bf16.msra.mxu1 %v883_v27 }
  0x84   :  { %v89_v24 = vpop.permute.xlu0 %88 }
  0x85   :  { %v91_v25 = vpop.permute.xlu1 %90  ;;  %v105_v26 = vsel %vm104_vm2, %v100_v23, %v89_v24 }
  0x86   :  { %776 = vmatmul.msk.f32.vlgmr.msra.gmra.mxu0 %vm111_vm3, %v105_v26  ;;  %v106_v33 = vsel %vm104_vm2, %v101_v28, %v91_v25  ;;  %v241_v25 = vpack.c.b16 %v237_v20, %v237_v20 }
  0x8c   :  { %v79_v30 = vpop.permute.xlu0 %78 }
  0x8d   :  { %v103_v31 = vsel %vm47_vm0, %v59_v29, %v79_v30  ;;  %v95_v32 = vpop.permute.xlu1 %94  ;;  %v247_v29 = vrot.slane %v241_v25, 6  ;;  %v882_v30 = vld [vmem:[%s1265_s4 + $0x8] sm:$0xff] }
  0x8e   :  { %777 = vmatmul.msk.f32.gmra.mxu0 %vm111_vm3, %v106_v33  ;;  %v108_v34 = vsel %vm104_vm2, %v103_v31, %v95_v32  ;;  %387 = vmatpush.bf16.msra.mxu1 %v882_v30 }
  0x8f   :  { %779 = vmatmul.msk.f32.gmra.mxu2 %vm111_vm3, %v108_v34 }
  0x92   :  { %388 = vmatpush.bf16.msra.mxu1 %v881_v35 }
  0xf7   :  { %v151_v38 = vpop.f32.mrf.mxu2 }
  0xf8   :  { %v163_v40 = vmul.f32 %v914_v37, %v151_v38 }
  0xfa   :  { %v171_v42 = vadd.f32 %v915_v39, %v163_v40 }
  0xfc   :  { %v175_v44 = vmax.f32 %v171_v42, 0.0 }
  0xfe   :  { %v184_v45 = vpack.c.bf16 %v175_v44, %v175_v44 }
 0x100   :  { %188 = vst.msk [vmem:[#allocation3 + $0x14] sm:$0xf] %vm177_vm4, %v184_v45 }
 0x103   :  { %v145_v47 = vpop.f32.mrf.mxu0 }
 0x104   :  { %v161_v48 = vmul.f32 %v914_v37, %v145_v47  ;;  %v935_v47 = vld [vmem:[#allocation3 + $0x10] sm:$0x8] }
 0x106   :  { %v169_v49 = vadd.f32 %v915_v39, %v161_v48 }
 0x107   :  { %v927_v14 = vld [vmem:[#allocation3 + $0x14] sm:$0xe] }
 0x108   :  { %v173_v50 = vmax.f32 %v169_v49, 0.0  ;;  %v978_v18 = vld [vmem:[#allocation3 + $0x10] sm:$0xf0]  }
 0x10a   :  { %v182_v51 = vpack.c.bf16 %v173_v50, %v173_v50  ;;  %v936_v50 = vor.u32 %v978_v18, %v935_v47 }
 0x10b   :  { %v148_v52 = vpop.f32.mrf.mxu0 }
 0x10c   :  { %186 = vst.msk [vmem:[#allocation3 + $0x4] sm:$0xf] %vm177_vm4, %v182_v51  ;;  %v162_v53 = vmul.f32 %v914_v37, %v148_v52 }
 0x10e   :  { %v170_v54 = vadd.f32 %v915_v39, %v162_v53 }
 0x110   :  { %v174_v55 = vmax.f32 %v170_v54, 0.0 }
 0x112   :  { %v183_v56 = vpack.c.bf16 %v174_v55, %v174_v55  ;;  %v154_v57 = vpop.f32.mrf.mxu2 }
 0x113   :  { %v164_v58 = vmul.f32 %v914_v37, %v154_v57  ;;  %v924_v2 = vld [vmem:[#allocation3 + $0x4] sm:$0xe] }
 0x114   :  { %187 = vst.msk [vmem:[#allocation3 + $0x8] sm:$0xf] %vm177_vm4, %v183_v56  ;;  %v977_v5 = vld [vmem:[#allocation3] sm:$0xf0]  }
 0x115   :  { %v172_v60 = vadd.f32 %v915_v39, %v164_v58  ;;  %v932_v39 = vor.u32 %v977_v5, %v931_v36  ;;  %v904_v58 = vld [vmem:[%s1268_s7 + $0x58] sm:$0xff]  ;;  %v898_v36 = vld [vmem:[%s1268_s7 + $0x28] sm:$0xff] }
 0x116   :  { %657 = vmatpush.bf16.msrb.mxu0 %v904_v58 }
 0x117   :  { %v176_v63 = vmax.f32 %v172_v60, 0.0  ;;  %v902_v60 = vld [vmem:[%s1268_s7 + $0x48] sm:$0xff] }
 0x119   :  { %v185_v1 = vpack.c.bf16 %v176_v63, %v176_v63  ;;  %v916_v63 = vld [vmem:[%s1266_s5] ss:$0 sm:$0xff] }
 0x11a   :  { %658 = vmatpush.bf16.msrb.mxu0 %v903_v59  ;;  %v893_v59 = vld [vmem:[%s1268_s7] sm:$0xff] }
 0x11b   :  { %189 = vst.msk [vmem:[#allocation3 + $0x18] sm:$0xf] %vm177_vm4, %v185_v1  ;;  %v191_v4 = vld [vmem:[#allocation3 + $0x4] sm:$0xff]  }
 0x11c   :  { %v923_v6 = vld [vmem:[#allocation3 + $0x4] sm:$0xf0]  ;;  %v224_v11 = vrot.slane %v191_v4, 5 }
 0x11d   :  { %v925_v8 = vor.u32 %v924_v2, %v923_v6  ;;  %v192_v37 = vld [vmem:[#allocation3 + $0x8] sm:$0x7]  ;;  %v917_v2 = vld [vmem:[%s1267_s6] ss:$0 sm:$0xff] }
 0x11e   :  { %226 = vrot.lane.b32.xlu2 %v224_v11, %s985_s14  ;;  %v210_v38 = vunpack.c.l.b16 %v192_v37  ;;  %659 = vmatpush.bf16.msrb.mxu0 %v902_v60  ;;  %v945_v60 = vld [vmem:[#allocation4] sm:$0xc] }
 0x11f   :  { %v243_v12 = vrot.slane %v925_v8, 6 }
 0x120   :  { %v215_v40 = vpack.c.b16 %v210_v38, %v210_v38 }
 0x121   :  { %v245_v15 = vsel %vm242_vm5, %v243_v12, %v244_v9  ;;  %v268_v16 = vrot.slane %v243_v12, 3 }
 0x122   :  { %v194_v17 = vld [vmem:[#allocation3 + $0x14] sm:$0xff]   ;;  %v269_v21 = vrot.slane %v245_v15, 3  ;;  %660 = vmatpush.bf16.msrb.mxu0 %v901_v61 }
 0x123   :  { %v926_v19 = vld [vmem:[#allocation3 + $0x14] sm:$0xf0]  ;;  %v225_v26 = vrot.slane %v194_v17, 5 }
 0x124   :  { %v270_v23 = vsel %vm264_vm6, %v268_v16, %v269_v21  ;;  %v928_v24 = vor.u32 %v927_v14, %v926_v19  ;;  %v195_v48 = vld [vmem:[#allocation3 + $0x18] sm:$0x7]  ;;  %v460_v14 = vld [vmem:[#allocation4 + $0xc] sm:$0x3] }
 0x125   :  { %828 = vmatmul.msk.bf16.vlgmr.msrb.gmra.mxu2 %vm249_vm7, %v270_v23  ;;  %228 = vrot.lane.b32.xlu0 %v225_v26, %s985_s14  ;;  %v213_v49 = vunpack.c.l.b16 %v195_v48  ;;  %v496_v15 = vunpack.c.l.b16 %v460_v14 }
 0x126   :  { %v246_v28 = vrot.slane %v928_v24, 6 }
 0x127   :  { %v217_v51 = vpack.c.b16 %v213_v49, %v213_v49  ;;  %v500_v17 = vpack.c.b16 %v496_v15, %v496_v15  ;;  %v894_v49 = vld [vmem:[%s1268_s7 + $0x8] sm:$0xff] }
 0x128   :  { %v248_v31 = vsel %vm242_vm5, %v246_v28, %v247_v29  ;;  %v274_v32 = vrot.slane %v246_v28, 3  ;;  %v900_v29 = vld [vmem:[%s1268_s7 + $0x38] sm:$0xff] }
 0x129   :  { %v275_v33 = vrot.slane %v248_v31, 3  ;;  %v522_v23 = vrot.slane %v500_v17, 2  ;;  %634 = vmatpush.bf16.msra.mxu3 %v900_v29  ;;  %v899_v31 = vld [vmem:[%s1268_s7 + $0x30] sm:$0xff] }
 0x12b   :  { %v276_v34 = vsel %vm264_vm6, %v274_v32, %v275_v33 }
 0x12d   :  { %635 = vmatpush.bf16.msra.mxu3 %v899_v31 }
 0x131   :  { %636 = vmatpush.bf16.msra.mxu3 %v898_v36  ;;  %v720_v36 = vld [vmem:[%s1271_s10 + $0x8] sm:$0xff] }
 0x135   :  { %829 = vmatmul.msk.bf16.gmra.mxu2 %vm249_vm7, %v276_v34 }
 0x178   :  { %v227_v41 = vpop.permute.xlu2 %226 }
 0x179   :  { %v252_v42 = vsel %vm249_vm7, %v932_v39, %v227_v41  ;;  %v254_v43 = vsel %vm249_vm7, %v215_v40, %v227_v41  ;;  %v897_v40 = vld [vmem:[%s1268_s7 + $0x20] sm:$0xff] }
 0x17a   :  { %v265_v44 = vrot.slane %v252_v42, 3  ;;  %v266_v45 = vrot.slane %v254_v43, 3  ;;  %637 = vmatpush.bf16.msra.mxu3 %v897_v40  ;;  %v896_v43 = vld [vmem:[%s1268_s7 + $0x18] sm:$0xff]  ;;  %v719_v40 = vld [vmem:[%s1271_s10] sm:$0xff] }
 0x17c   :  { %v267_v46 = vsel %vm264_vm6, %v265_v44, %v266_v45  ;;  %v462_v45 = vld [vmem:[#allocation4 + $0x1c] sm:$0x3] }
 0x17d   :  { %389 = vmatmul.bf16.vlgmr.msra.gmra.mxu1 %v267_v46  ;;  %v895_v46 = vld [vmem:[%s1268_s7 + $0x10] sm:$0xff]  ;;  %v498_v47 = vunpack.c.l.b16 %v462_v45 }
 0x17e   :  { %638 = vmatpush.bf16.msra.mxu3 %v896_v43 }
 0x182   :  { %639 = vmatpush.bf16.msra.mxu3 %v895_v46  ;;  %v986_v46 = vmov 16.0  }
 0x183   :  { %921 = vrcp.f32 %v986_v46 }
 0x186   :  { %640 = vmatpush.bf16.msra.mxu3 %v894_v49 }
 0x18a   :  { %641 = vmatpush.bf16.msra.mxu3 %v893_v59 }
 0x197   :  { %v229_v52 = vpop.permute.xlu0 %228 }
 0x198   :  { %v257_v53 = vsel %vm249_vm7, %v936_v50, %v229_v52  ;;  %v259_v54 = vsel %vm249_vm7, %v217_v51, %v229_v52  ;;  %v502_v50 = vpack.c.b16 %v498_v47, %v498_v47 }
 0x199   :  { %v271_v55 = vrot.slane %v257_v53, 3  ;;  %v272_v56 = vrot.slane %v259_v54, 3 }
 0x19b   :  { %v273_v57 = vsel %vm264_vm6, %v271_v55, %v272_v56  ;;  %v528_v55 = vrot.slane %v502_v50, 2 }
 0x19c   :  { %394 = vmatmul.bf16.gmra.mxu1 %v273_v57 }
 0x1a8   :  { %v409_v62 = vpop.f32.mrf.mxu2 }
 0x1b0   :  { %v411_v6 = vpop.f32.mrf.mxu2 }
 0x1b8   :  { %v414_v21 = vpop.f32.mrf.mxu2 }
 0x1c0   :  { %v416_v34 = vpop.f32.mrf.mxu2 }
 0x1fa   :  { %v390_v0 = vpop.f32.mrf.mxu1 }
 0x1fb   :  { %v410_v1 = vadd.f32 %v409_v62, %v390_v0 }
 0x1fd   :  { %v423_v3 = vmul.f32 %v916_v63, %v410_v1 }
 0x1ff   :  { %v431_v4 = vadd.f32 %v917_v2, %v423_v3 }
 0x201   :  { %v435_v5 = vmax.f32 %v431_v4, 0.0 }
 0x202   :  { %v392_v7 = vpop.f32.mrf.mxu1 }
 0x203   :  { %v443_v8 = vpack.c.bf16 %v435_v5, %v435_v5  ;;  %v412_v9 = vadd.f32 %v411_v6, %v392_v7  ;;  %v949_v7 = vld [vmem:[#allocation4 + $0x10] sm:$0xc] }
 0x205   :  { %447 = vst.msk [vmem:[#allocation4 + $0x4] sm:$0xf] %vm177_vm4, %v443_v8  ;;  %v424_v10 = vmul.f32 %v916_v63, %v412_v9 }
 0x207   :  { %v432_v11 = vadd.f32 %v917_v2, %v424_v10 }
 0x209   :  { %v436_v12 = vmax.f32 %v432_v11, 0.0 }
 0x20b   :  { %v444_v13 = vpack.c.bf16 %v436_v12, %v436_v12 }
 0x20c   :  { %v938_v16 = vld [vmem:[#allocation4 + $0x4] sm:$0xc] }
 0x20d   :  { %448 = vst.msk [vmem:[#allocation4 + $0x8] sm:$0xf] %vm177_vm4, %v444_v13  ;;  %v1179_v19 = vld [vmem:[#allocation4] sm:$0xf0]  }
 0x214   :  { %v452_v18 = vld [vmem:[#allocation4 + $0x4] sm:$0xff]  }
 0x215   :  { %v937_v20 = vld [vmem:[#allocation4 + $0x4] sm:$0xf0]  ;;  %v485_v25 = vrot.slane %v452_v18, 6 }
 0x216   :  { %v939_v22 = vor.u32 %v938_v16, %v937_v20  ;;  %v453_v61 = vld [vmem:[#allocation4 + $0x8] sm:$0x3]  ;;  %v725_v20 = vld [vmem:[%s1271_s10 + $0x30] sm:$0xff] }
 0x217   :  { %487 = vrot.lane.b32.xlu1 %v485_v25, %s985_s14  ;;  %v471_v62 = vunpack.c.l.b16 %v453_v61 }
 0x218   :  { %v521_v26 = vrot.slane %v939_v22, 2 }
 0x219   :  { %v395_v24 = vpop.f32.mrf.mxu1  ;;  %v476_v0 = vpack.c.b16 %v471_v62, %v471_v62 }
 0x21a   :  { %v415_v27 = vadd.f32 %v414_v21, %v395_v24  ;;  %v523_v28 = vsel %vm517_vm8, %v521_v26, %v522_v23  ;;  %v918_v23 = vld [vmem:[%s1269_s8] ss:$0 sm:$0xff] }
 0x21b   :  { %878 = vmatmul.msk.bf16.vlgmr.msrb.gmra.mxu0 %vm249_vm7, %v523_v28  ;;  %v919_v26 = vld [vmem:[%s1270_s9] ss:$0 sm:$0xff] }
 0x21c   :  { %v425_v30 = vmul.f32 %v916_v63, %v415_v27  ;;  %v724_v27 = vld [vmem:[%s1271_s10 + $0x28] sm:$0xff] }
 0x21e   :  { %v433_v32 = vadd.f32 %v917_v2, %v425_v30  ;;  %v723_v30 = vld [vmem:[%s1271_s10 + $0x20] sm:$0xff] }
 0x220   :  { %v437_v33 = vmax.f32 %v433_v32, 0.0 }
 0x221   :  { %v397_v35 = vpop.f32.mrf.mxu1 }
 0x222   :  { %v445_v37 = vpack.c.bf16 %v437_v33, %v437_v33  ;;  %v417_v38 = vadd.f32 %v416_v34, %v397_v35  ;;  %v722_v33 = vld [vmem:[%s1271_s10 + $0x18] sm:$0xff]  ;;  %v721_v34 = vld [vmem:[%s1271_s10 + $0x10] sm:$0xff] }
 0x224   :  { %449 = vst.msk [vmem:[#allocation4 + $0x14] sm:$0xf] %vm177_vm4, %v445_v37  ;;  %v426_v39 = vmul.f32 %v916_v63, %v417_v38  ;;  %v946_v63 = vor.u32 %v1179_v19, %v945_v60  ;;  %v726_v19 = vld [vmem:[%s1271_s10 + $0x38] sm:$0xff] }
 0x225   :  { %745 = vmatpush.msra.mxu2 %v726_v19 }
 0x226   :  { %v434_v41 = vadd.f32 %v917_v2, %v426_v39 }
 0x227   :  { %746 = vmatpush.msra.mxu2 %v725_v20 }
 0x228   :  { %v438_v42 = vmax.f32 %v434_v41, 0.0 }
 0x229   :  { %747 = vmatpush.msra.mxu2 %v724_v27 }
 0x22a   :  { %v446_v44 = vpack.c.bf16 %v438_v42, %v438_v42 }
 0x22b   :  { %v941_v48 = vld [vmem:[#allocation4 + $0x14] sm:$0xc]  ;;  %748 = vmatpush.msra.mxu2 %v723_v30 }
 0x22c   :  { %450 = vst.msk [vmem:[#allocation4 + $0x18] sm:$0xf] %vm177_vm4, %v446_v44  ;;  %v980_v52 = vld [vmem:[#allocation4 + $0x10] sm:$0xf0]  }
 0x22d   :  { %v950_v11 = vor.u32 %v980_v52, %v949_v7  ;;  %749 = vmatpush.msra.mxu2 %v722_v33 }
 0x22f   :  { %750 = vmatpush.msra.mxu2 %v721_v34 }
 0x231   :  { %751 = vmatpush.msra.mxu2 %v720_v36 }
 0x233   :  { %v455_v51 = vld [vmem:[#allocation4 + $0x14] sm:$0xff]   ;;  %752 = vmatpush.msra.mxu2 %v719_v40 }
 0x234   :  { %v940_v53 = vld [vmem:[#allocation4 + $0x14] sm:$0xf0]  ;;  %v486_v56 = vrot.slane %v455_v51, 6 }
 0x235   :  { %v942_v54 = vor.u32 %v941_v48, %v940_v53  ;;  %v456_v8 = vld [vmem:[#allocation4 + $0x18] sm:$0x3]  ;;  %v922_v53 = vpop.eup %921 }
 0x236   :  { %489 = vrot.lane.b32.xlu2 %v486_v56, %s985_s14  ;;  %v474_v9 = vunpack.c.l.b16 %v456_v8  ;;  %vm715_vm9 = vweird.f32 %v922_v53 }
 0x237   :  { %v527_v57 = vrot.slane %v942_v54, 2 }
 0x238   :  { %v478_v12 = vpack.c.b16 %v474_v9, %v474_v9 }
 0x239   :  { %v529_v58 = vsel %vm517_vm8, %v527_v57, %v528_v55 }
 0x23a   :  { %879 = vmatmul.msk.bf16.gmra.mxu0 %vm249_vm7, %v529_v58  ;;  %v711_v58 = vmul.f32 16.0, %v922_v53 }
 0x289   :  { %v488_v1 = vpop.permute.xlu1 %487 }
 0x28a   :  { %v505_v2 = vsel %vm249_vm7, %v946_v63, %v488_v1  ;;  %v507_v3 = vsel %vm249_vm7, %v476_v0, %v488_v1  ;;  %v712_v63 = vsub.f32 1.0, %v711_v58 }
 0x28b   :  { %v518_v4 = vrot.slane %v505_v2, 2  ;;  %v519_v5 = vrot.slane %v507_v3, 2 }
 0x28c   :  { %v713_v3 = vmul.f32 %v922_v53, %v712_v63 }
 0x28d   :  { %v520_v6 = vsel %vm517_vm8, %v518_v4, %v519_v5 }
 0x28e   :  { %642 = vmatmul.bf16.vlgmr.msra.gmra.mxu3 %v520_v6  ;;  %v714_v7 = vadd.f32 %v922_v53, %v713_v3 }
 0x290   :  { %v490_v10 = vpop.permute.xlu2 %489 }
 0x291   :  { %v510_v13 = vsel %vm249_vm7, %v950_v11, %v490_v10  ;;  %v512_v14 = vsel %vm249_vm7, %v478_v12, %v490_v10  ;;  %v716_v11 = vsel %vm715_vm9, %v922_v53, %v714_v7 }
 0x292   :  { %v524_v15 = vrot.slane %v510_v13, 2  ;;  %v525_v16 = vrot.slane %v512_v14, 2 }
 0x294   :  { %v526_v17 = vsel %vm517_vm8, %v524_v15, %v525_v16  ;;  %v920_v16 = vld [vmem:[%s1272_s11] ss:$0 sm:$0xff] }
 0x298   :  { %v662_v18 = vpop.f32.mrf.mxu0 }
 0x29e   :  { %647 = vmatmul.bf16.gmra.mxu3 %v526_v17 }
 0x2a0   :  { %v664_v24 = vpop.f32.mrf.mxu0 }
 0x2b7   :  { %v667_v37 = vpop.f32.mrf.mxu0 }
 0x2bf   :  { %v669_v48 = vpop.f32.mrf.mxu0 }
 0x311   :  { %v643_v21 = vpop.f32.mrf.mxu3 }
 0x312   :  { %v663_v22 = vadd.f32 %v662_v18, %v643_v21 }
 0x314   :  { %v676_v25 = vmul.f32 %v918_v23, %v663_v22 }
 0x316   :  { %v684_v31 = vadd.f32 %v919_v26, %v676_v25 }
 0x318   :  { %v688_v38 = vmax.f32 %v684_v31, 0.0 }
 0x319   :  { %v645_v28 = vpop.f32.mrf.mxu3 }
 0x31a   :  { %v665_v29 = vadd.f32 %v664_v24, %v645_v28  ;;  %v692_v44 = vsel %vm249_vm7, %v688_v38, 0.0 }
 0x31c   :  { %v677_v32 = vmul.f32 %v918_v23, %v665_v29 }
 0x31e   :  { %v685_v35 = vadd.f32 %v919_v26, %v677_v32 }
 0x320   :  { %v689_v39 = vmax.f32 %v685_v35, 0.0 }
 0x321   :  { %v648_v41 = vpop.f32.mrf.mxu3 }
 0x322   :  { %v693_v42 = vsel %vm249_vm7, %v689_v39, 0.0  ;;  %v668_v43 = vadd.f32 %v667_v37, %v648_v41 }
 0x323   :  { %v694_v45 = vadd.f32 %v693_v42, %v692_v44 }
 0x324   :  { %v678_v47 = vmul.f32 %v918_v23, %v668_v43 }
 0x325   :  { %v695_v49 = vrot.slane %v694_v45, 4 }
 0x326   :  { %v686_v51 = vadd.f32 %v919_v26, %v678_v47 }
 0x327   :  { %v696_v55 = vadd.f32 %v695_v49, %v694_v45 }
 0x328   :  { %v690_v56 = vmax.f32 %v686_v51, 0.0 }
 0x329   :  { %v650_v50 = vpop.f32.mrf.mxu3  ;;  %v697_v60 = vrot.slane %v696_v55, 2 }
 0x32a   :  { %v670_v52 = vadd.f32 %v669_v48, %v650_v50  ;;  %v701_v61 = vsel %vm249_vm7, %v690_v56, 0.0 }
 0x32b   :  { %v698_v1 = vadd.f32 %v697_v60, %v696_v55 }
 0x32c   :  { %v679_v54 = vmul.f32 %v918_v23, %v670_v52 }
 0x32d   :  { %v699_v5 = vrot.slane %v698_v1, 1 }
 0x32e   :  { %v687_v57 = vadd.f32 %v919_v26, %v679_v54 }
 0x32f   :  { %v700_v10 = vadd.f32 %v699_v5, %v698_v1 }
 0x330   :  { %v691_v59 = vmax.f32 %v687_v57, 0.0 }
 0x331   :  { %v717_v13 = vmul.f32 %v716_v11, %v700_v10 }
 0x332   :  { %v702_v62 = vsel %vm249_vm7, %v691_v59, 0.0 }
 0x333   :  { %v703_v0 = vadd.f32 %v702_v62, %v701_v61 }
 0x335   :  { %v704_v2 = vrot.slane %v703_v0, 4 }
 0x337   :  { %v705_v4 = vadd.f32 %v704_v2, %v703_v0 }
 0x339   :  { %v706_v6 = vrot.slane %v705_v4, 2 }
 0x33b   :  { %v707_v8 = vadd.f32 %v706_v6, %v705_v4 }
 0x33d   :  { %v708_v9 = vrot.slane %v707_v8, 1 }
 0x33f   :  { %v709_v12 = vadd.f32 %v708_v9, %v707_v8 }
 0x341   :  { %v718_v14 = vmul.f32 %v716_v11, %v709_v12 }
 0x343   :  { %v734_v15 = vsel %vm733_vm10, %v718_v14, %v717_v13 }
 0x344   :  { %880 = vmatmul.msk.f32.vlgmr.msra.gmra.mxu2 %vm249_vm7, %v734_v15 }
 0x3c7   :  { %v754_v17 = vpop.f32.mrf.mxu2 }
 0x3c8   :  { %v755_v18 = vadd.f32 %v920_v16, %v754_v17 }
 0x3ca   :  { %758 = vst.msk [vmem:[#allocation5] sm:$0x3] %vm757_vm11, %v755_v18 }
 0x3cb   :  { %769 = dma.vmem_to_hbm [thread:$0]  %s765_s20, 32, %s767_s22, [#allocation6]  }
 0x3cc   :  { %975 = dma.done.wait [#allocation6], 32  }
 0x3cd   :  { %976 = vsyncadd [#allocation6], 4294967264 }
 0x3ce   :  { %774 = vsyncpa [#allocation6], 1 }

</bundles_post_ra>
